<compile_context>
chip_gen: v7x
topology: tpu7x:2x2x1
jax: 0.10.0
libtpu: 0.0.40
codegen_flags: <defaults>
</compile_context>

<pallas_src>
import jax
import jax.numpy as jnp
from jax import lax
from jax.experimental import pallas as pl
from jax.experimental.pallas import tpu as pltpu  # noqa: F401  (TPU backend)


def _dim_reduce_kernel(x_ref, w_ref, b_ref, o_ref):
    # x_ref: (B, K) f32, w_ref: (K, N) bf16, b_ref: (1, N) f32, o_ref: (B, N) f32
    # In-kernel bf16 cast of the tiny activation tile (free on the VPU); the
    # MXU accumulates in f32 via preferred_element_type.
    x_bf16 = x_ref[...].astype(jnp.bfloat16)
    acc = jnp.dot(x_bf16, w_ref[...], preferred_element_type=jnp.float32)
    acc = acc + b_ref[...]
    # F.normalize(p=2, dim=1): out / max(||out||_2, 1e-12)
    #   == out * rsqrt(max(||out||_2^2, 1e-24))   (sqrt is monotonic)
    sq_norm = jnp.sum(acc * acc, axis=1, keepdims=True)
    inv = lax.rsqrt(jnp.maximum(sq_norm, 1e-24))
    o_ref[...] = (acc * inv).astype(o_ref.dtype)


def prepare_params(weight, bias):
    """One-time parameter prep (outside the per-call hot path).

    weight: (N, K) as stored by nn.Linear  ->  (K, N) bf16 for the MXU.
    bias:   (N,)                           ->  (1, N) f32.
    """
    w_t = jnp.asarray(weight, jnp.float32).T.astype(jnp.bfloat16)   # (K, N)
    b2 = jnp.asarray(bias, jnp.float32).reshape(1, -1)               # (1, N)
    return w_t, b2


@jax.jit
def dim_reduction_forward(x, w_t, b2):
    """x: (B, C, H, W) f32; w_t: (K, N) bf16 (pre-transposed); b2: (1, N) f32."""
    B = x.shape[0]
    # Metadata-only reshape; the bf16 cast happens inside the kernel.
    x_flat = x.reshape(B, -1).astype(jnp.float32)                    # (B, K) f32
    K, N = w_t.shape

    cost = pl.CostEstimate(
        flops=2 * B * K * N,
        transcendentals=B,                    # one rsqrt per row
        bytes_accessed=(B * K * 4) + (K * N * 2) + (N * 4) + (B * N * 4),
    )

    return pl.pallas_call(
        _dim_reduce_kernel,
        out_shape=jax.ShapeDtypeStruct((B, N), jnp.float32),
        # No grid: single invocation, full-array blocks (block shape == array
        # shape, so the (8,128) tiling rule is satisfied even with B=2).
        in_specs=[
            pl.BlockSpec((B, K), lambda: (0, 0)),
            pl.BlockSpec((K, N), lambda: (0, 0)),
            pl.BlockSpec((1, N), lambda: (0, 0)),
        ],
        out_specs=pl.BlockSpec((B, N), lambda: (0, 0)),
        cost_estimate=cost,
    )(x_flat, w_t, b2)


def _reference(x, weight, bias):
    """Pure-JAX reference using the same bf16-rounded operands as the kernel."""
    xf = x.reshape(x.shape[0], -1).astype(jnp.bfloat16).astype(jnp.float32)
    wf = jnp.asarray(weight, jnp.float32).astype(jnp.bfloat16).astype(jnp.float32)
    out = jnp.dot(xf, wf.T, precision=lax.Precision.HIGHEST)
    out = out + jnp.asarray(bias, jnp.float32)
    n = jnp.sqrt(jnp.sum(out * out, axis=1, keepdims=True))
    return out / jnp.maximum(n, 1e-12)


if __name__ == "__main__":
    # Small shapes consistent with the module's forward:
    # x: (B=2, C=4, H=16, W=16) -> flattened K = 1024, vectordim N = 128.
    B, C, H, W = 2, 4, 16, 16
    K = C * H * W
    N = 128

    key = jax.random.PRNGKey(0)
    kx, kw, kb = jax.random.split(key, 3)
    x = jax.random.normal(kx, (B, C, H, W), dtype=jnp.float32)

    # The module's __init__ zero-initializes weight and bias (degenerate case:
    # output is all zeros after normalize-with-eps). Run that case faithfully,
    # plus a deterministic nonzero case to exercise the matmul + normalize path.
    w_zero = jnp.zeros((N, K), dtype=jnp.float32)
    b_zero = jnp.zeros((N,), dtype=jnp.float32)
    w_rand = 0.02 * jax.random.normal(kw, (N, K), dtype=jnp.float32)
    b_rand = 0.02 * jax.random.normal(kb, (N,), dtype=jnp.float32)

    # Parameter prep is done ONCE, outside the per-call hot path.
    wt_zero, b2_zero = prepare_params(w_zero, b_zero)
    wt_rand, b2_rand = prepare_params(w_rand, b_rand)

    out_zero = jax.block_until_ready(dim_reduction_forward(x, wt_zero, b2_zero))
    ref_zero = _reference(x, w_zero, b_zero)
    assert out_zero.shape == (B, N)
    assert jnp.allclose(out_zero, ref_zero, atol=1e-5), "zero-init mismatch"

    out_rand = jax.block_until_ready(dim_reduction_forward(x, wt_rand, b2_rand))
    ref_rand = _reference(x, w_rand, b_rand)
    assert jnp.allclose(out_rand, ref_rand, atol=1e-4, rtol=1e-4), "mismatch"

    print("KERNEL_OK")
</pallas_src>

<mosaic_0001>
module attributes {stable_mosaic.version = 11 : i64} {
  func.func @_dim_reduce_kernel(%arg0: memref<2x1024xf32, #tpu.memory_space<vmem>>, %arg1: memref<1024x128xbf16, #tpu.memory_space<vmem>>, %arg2: memref<1x128xf32, #tpu.memory_space<vmem>>, %arg3: memref<2x128xf32, #tpu.memory_space<vmem>>) attributes {dimension_semantics = [], scalar_prefetch = 0 : i64, scratch_operands = 0 : i64, tpu.core_type = #tpu.core_type<tc>} {
    %c0 = arith.constant 0 : index
    %c0_0 = arith.constant 0 : index
    %0 = vector.load %arg0[%c0, %c0_0] : memref<2x1024xf32, #tpu.memory_space<vmem>>, vector<2x1024xf32>
    %1 = arith.truncf %0 : vector<2x1024xf32> to vector<2x1024xbf16>
    %c0_1 = arith.constant 0 : index
    %c0_2 = arith.constant 0 : index
    %2 = vector.load %arg1[%c0_1, %c0_2] : memref<1024x128xbf16, #tpu.memory_space<vmem>>, vector<1024x128xbf16>
    %cst = arith.constant dense<0.000000e+00> : vector<2x128xf32>
    %3 = tpu.matmul %1, %2, %cst {dimension_numbers = #tpu.dot_dimension_numbers<[1], [0], [0], [1], [0, 0, 1, 1], [], []>} : vector<2x1024xbf16>, vector<1024x128xbf16>, vector<2x128xf32> -> vector<2x128xf32>
    %c0_3 = arith.constant 0 : index
    %c0_4 = arith.constant 0 : index
    %4 = vector.load %arg2[%c0_3, %c0_4] : memref<1x128xf32, #tpu.memory_space<vmem>>, vector<1x128xf32>
    %5 = vector.broadcast %4 : vector<1x128xf32> to vector<2x128xf32>
    %6 = arith.addf %3, %5 : vector<2x128xf32>
    %7 = arith.mulf %6, %6 : vector<2x128xf32>
    %cst_5 = arith.constant dense<0.000000e+00> : vector<2xf32>
    %8 = vector.multi_reduction <add>, %7, %cst_5 [1] : vector<2x128xf32> to vector<2xf32>
    %9 = vector.shape_cast %8 : vector<2xf32> to vector<2x1xf32>
    %cst_6 = arith.constant 1.000000e-24 : f32
    %10 = vector.broadcast %cst_6 : f32 to vector<2x1xf32>
    %11 = arith.maximumf %9, %10 : vector<2x1xf32>
    %12 = math.rsqrt %11 : vector<2x1xf32>
    %13 = vector.broadcast %12 : vector<2x1xf32> to vector<2x128xf32>
    %14 = arith.mulf %6, %13 : vector<2x128xf32>
    %c0_7 = arith.constant 0 : index
    %c0_8 = arith.constant 0 : index
    %15 = vector.load %arg3[%c0_7, %c0_8] : memref<2x128xf32, #tpu.memory_space<vmem>>, vector<2x128xf32>
    tpu.vector_store %arg3[%c0_7, %c0_8], %14 {strides = array<i32>} : memref<2x128xf32, #tpu.memory_space<vmem>>, vector<2x128xf32>,
    return
  }
}

</mosaic_0001>

<bundles_post_ra>
// kernel: dim_reduction_forward.1
= control target key start
LH: loop header
LB: loop body
LE: loop exit
PB: predicated region body
PF: predicated region fallthrough
CT: control target
= control target key end

     0   :  { %8 = vsyncpa [#allocation3], 0  ;;  %s1125_s0 = inlined_call_operand.vmem [shape: f32[2,1024], index: 0, kind: input, shape index: {}]   ;;  %s1126_s1 = inlined_call_operand.hbm [shape: bf16[1024,128], index: 1, kind: input, shape index: {}]   ;;  %s1127_s2 = inlined_call_operand.vmem [shape: f32[1,128], index: 2, kind: input, shape index: {}]   ;;  %s1128_s3 = inlined_call_operand.hbm [shape: f32[2,128], index: 3, kind: output, shape index: {}]  }
   0x1   :  { %9 = vsyncpa [#allocation4], 0  ;;  %s1061_s12 = smov [#allocation2]   ;;  %s1013_s16 = scalar_lea.hbm %s1126_s1, 8192 }
   0x2   :  { %s17_s13 = sshll.u32 %s1061_s12, 4  ;;  %p1014_p0 = scmp.ne.s32.totalorder %s1126_s1, %s1013_s16  ;;  %s18_s13 = int_to_ptr.vmem [resolvable:$true] %s17_s13 }
   0x3   :  { %p1017_p1 = scmp.lt.u32.totalorder %s1013_s16, %s1126_s1 }
   0x5   :  { %p1019_p2 = pnand %p1017_p1, %p1014_p0 }
   0x7   :  { %1022 = shalt.err (!%p1019_p2)
}
   0x8   :  { %s1023_s21 = scalar_lea.vmem %s18_s13, 8192  ;;  %p1028_p4 = scmp.lt.s32.totalorder %s18_s13, %s18_s13 }
   0x9   :  { %p1024_p3 = scmp.ne.s32.totalorder %s18_s13, %s1023_s21  ;;  %p1029_p5 = scmp.lt.s32.totalorder %s1023_s21, %s1023_s21 }
   0xb   :  { %p1030_p6 = por %p1029_p5, %p1028_p4 }
   0xd   :  { %p1031_p7 = pnand %p1030_p6, %p1024_p3 }
   0xf   :  { %1034 = shalt.err (!%p1031_p7)
}
  0x10   :  { %s1062_s22 = smov 64   ;;  %s1063_s23 = smov 4  }
  0x11   :  { %23 = dma.hbm_to_vmem [thread:$0]  %s1126_s1, 8192, %s18_s13, [#allocation3], %s1062_s22, %s1062_s22, %s1063_s23  }
  0x12   :  { %1057 = dma.done.wait [#allocation3], 8192  }
  0x13   :  { %1058 = vsyncadd [#allocation3], 4294959104  ;;  %v945_v0 = vld [vmem:[#allocation2 + $0x40] sm:$0xff]   ;;  %v949_v4 = vld [vmem:[#allocation2 + $0x48] sm:$0xff]   ;;  %v1064_v22 = vmov 1983009808   ;;  %v38_v24 = vlaneseq }
  0x14   :  { %v946_v1 = vld [vmem:[#allocation2 + $0xc0] sm:$0xff]   ;;  %852 = vmatprep.subr.bf16.mxu0 %v945_v0  ;;  %v950_v5 = vld [vmem:[#allocation2 + $0xc8] sm:$0xff]   ;;  %v953_v8 = vld [vmem:[#allocation2 + $0x50] sm:$0xff]   ;;  %v36_v23 = vunpack.c.l.s4 %v1064_v22  ;;  %vm764_vm0 = vcmask 1041408  }
  0x15   :  { %v947_v2 = vld [vmem:[#allocation2] sm:$0xff]   ;;  %874 = vmatprep.subr.bf16.mxu1 %v946_v1  ;;  %v951_v6 = vld [vmem:[#allocation2 + $0x8] sm:$0xff]   ;;  %v954_v9 = vld [vmem:[#allocation2 + $0xd0] sm:$0xff]   ;;  %v39_v30 = vshrl.u32 %v38_v24, 7 }
  0x16   :  { %v948_v3 = vld [vmem:[#allocation2 + $0x80] sm:$0xff]   ;;  %853 = vmatpush3.bf16.msra.mxu0 %v947_v2  ;;  %v952_v7 = vld [vmem:[#allocation2 + $0x88] sm:$0xff]   ;;  %v955_v10 = vld [vmem:[#allocation2 + $0x10] sm:$0xff]   ;;  %v37_v29 = vunpack.c.0.s8 %v36_v23 }
  0x17   :  { %875 = vmatpush3.bf16.msra.mxu1 %v948_v3  ;;  %854 = vmatprep.subr.bf16.mxu0 %v949_v4  ;;  %v956_v11 = vld [vmem:[#allocation2 + $0x90] sm:$0xff]   ;;  %v957_v12 = vld [vmem:[#allocation2 + $0x58] sm:$0xff]   ;;  %v961_v16 = vld [vmem:[#allocation2 + $0x60] sm:$0xff]  }
  0x18   :  { %876 = vmatprep.subr.bf16.mxu1 %v950_v5  ;;  %v958_v13 = vld [vmem:[#allocation2 + $0xd8] sm:$0xff]   ;;  %v962_v17 = vld [vmem:[#allocation2 + $0xe0] sm:$0xff]   ;;  %v965_v20 = vld [vmem:[#allocation2 + $0x68] sm:$0xff]   ;;  %v1098_v35 = vsub.s32 %v37_v29, %v39_v30 }
  0x19   :  { %v959_v14 = vld [vmem:[#allocation2 + $0x18] sm:$0xff]   ;;  %v963_v18 = vld [vmem:[#allocation2 + $0x20] sm:$0xff]   ;;  %v966_v21 = vld [vmem:[#allocation2 + $0xe8] sm:$0xff]  }
  0x1a   :  { %855 = vmatpush3.bf16.msra.mxu0 %v951_v6  ;;  %v960_v15 = vld [vmem:[#allocation2 + $0x98] sm:$0xff]   ;;  %v964_v19 = vld [vmem:[#allocation2 + $0xa0] sm:$0xff]   ;;  %v967_v25 = vld [vmem:[#allocation2 + $0x28] sm:$0xff]  }
  0x1b   :  { %877 = vmatpush3.bf16.msra.mxu1 %v952_v7  ;;  %856 = vmatprep.subr.bf16.mxu0 %v953_v8  ;;  %v968_v26 = vld [vmem:[#allocation2 + $0xa8] sm:$0xff]   ;;  %v969_v27 = vld [vmem:[#allocation2 + $0x70] sm:$0xff]   ;;  %v973_v33 = vld [vmem:[#allocation2 + $0x78] sm:$0xff]  }
  0x1c   :  { %878 = vmatprep.subr.bf16.mxu1 %v954_v9  ;;  %v970_v28 = vld [vmem:[#allocation2 + $0xf0] sm:$0xff]   ;;  %v974_v34 = vld [vmem:[#allocation2 + $0xf8] sm:$0xff]   ;;  %v30_v38 = vld [vmem:[%s1125_s0] sm:$0xff] }
  0x1d   :  { %v971_v31 = vld [vmem:[#allocation2 + $0x30] sm:$0xff]   ;;  %v975_v36 = vld [vmem:[#allocation2 + $0x38] sm:$0xff]   ;;  %v41_v39 = vrot.slane %v30_v38, %v1098_v35  ;;  %v34_v40 = vcombine.high %v30_v38, %v30_v38  ;;  %v978_v41 = vld [vmem:[#allocation2 + $0x140] sm:$0xff]  }
  0x1e   :  { %857 = vmatpush3.bf16.msra.mxu0 %v955_v10  ;;  %v972_v32 = vld [vmem:[#allocation2 + $0xb0] sm:$0xff]   ;;  %v976_v37 = vld [vmem:[#allocation2 + $0xb8] sm:$0xff]   ;;  %v979_v42 = vld [vmem:[#allocation2 + $0x1c0] sm:$0xff]  }
  0x1f   :  { %879 = vmatpush3.bf16.msra.mxu1 %v956_v11  ;;  %858 = vmatprep.subr.bf16.mxu0 %v957_v12  ;;  %v49_v43 = vcombine.high %v41_v39, %v41_v39  ;;  %v48_v44 = vrot.slane %v34_v40, %v1098_v35  ;;  %v76_v45 = vpack.c.bf16 %v41_v39, %v41_v39  ;;  %v980_v48 = vld [vmem:[#allocation2 + $0x100] sm:$0xff]   ;;  %v982_v50 = vld [vmem:[#allocation2 + $0x148] sm:$0xff]   ;;  %v986_v55 = vld [vmem:[#allocation2 + $0x150] sm:$0xff]  }
  0x20   :  { %880 = vmatprep.subr.bf16.mxu1 %v958_v13  ;;  %v981_v52 = vld [vmem:[#allocation2 + $0x180] sm:$0xff]   ;;  %v983_v53 = vld [vmem:[#allocation2 + $0x1c8] sm:$0xff]   ;;  %v987_v57 = vld [vmem:[#allocation2 + $0x1d0] sm:$0xff]  }
  0x21   :  { %v77_v46 = vpack.c.bf16 %v49_v43, %v49_v43  ;;  %v50_v47 = vcombine.high %v48_v44, %v48_v44  ;;  %v78_v49 = vpack.c.bf16 %v48_v44, %v48_v44  ;;  %v984_v54 = vld [vmem:[#allocation2 + $0x108] sm:$0xff]   ;;  %v988_v58 = vld [vmem:[#allocation2 + $0x110] sm:$0xff]   ;;  %v990_v59 = vld [vmem:[#allocation2 + $0x158] sm:$0xff]  }
  0x22   :  { %859 = vmatpush3.bf16.msra.mxu0 %v959_v14  ;;  %v985_v56 = vld [vmem:[#allocation2 + $0x188] sm:$0xff]   ;;  %v989_v60 = vld [vmem:[#allocation2 + $0x190] sm:$0xff]   ;;  %v991_v61 = vld [vmem:[#allocation2 + $0x1d8] sm:$0xff]  }
  0x23   :  { %881 = vmatpush3.bf16.msra.mxu1 %v960_v15  ;;  %860 = vmatprep.subr.bf16.mxu0 %v961_v16  ;;  %v79_v51 = vpack.c.bf16 %v50_v47, %v50_v47  ;;  %v992_v62 = vld [vmem:[#allocation2 + $0x118] sm:$0xff]   ;;  %v994_v63 = vld [vmem:[#allocation2 + $0x160] sm:$0xff]   ;;  %v998_v3 = vld [vmem:[#allocation2 + $0x168] sm:$0xff]  }
  0x24   :  { %882 = vmatprep.subr.bf16.mxu1 %v962_v17  ;;  %635 = vmatprep.mubr.bf16.mxu0 %v77_v46  ;;  %v993_v0 = vld [vmem:[#allocation2 + $0x198] sm:$0xff]   ;;  %v995_v1 = vld [vmem:[#allocation2 + $0x1e0] sm:$0xff]   ;;  %v999_v5 = vld [vmem:[#allocation2 + $0x1e8] sm:$0xff]  }
  0x25   :  { %675 = vmatprep.mubr.bf16.mxu1 %v79_v51  ;;  %v996_v2 = vld [vmem:[#allocation2 + $0x120] sm:$0xff]   ;;  %v1000_v6 = vld [vmem:[#allocation2 + $0x128] sm:$0xff]   ;;  %v1002_v7 = vld [vmem:[#allocation2 + $0x170] sm:$0xff]  }
  0x26   :  { %861 = vmatpush3.bf16.msra.mxu0 %v963_v18  ;;  %v997_v4 = vld [vmem:[#allocation2 + $0x1a0] sm:$0xff]   ;;  %v1001_v8 = vld [vmem:[#allocation2 + $0x1a8] sm:$0xff]   ;;  %v1003_v9 = vld [vmem:[#allocation2 + $0x1f0] sm:$0xff]  }
  0x27   :  { %883 = vmatpush3.bf16.msra.mxu1 %v964_v19  ;;  %862 = vmatprep.subr.bf16.mxu0 %v965_v20  ;;  %v1004_v10 = vld [vmem:[#allocation2 + $0x130] sm:$0xff]   ;;  %v1006_v11 = vld [vmem:[#allocation2 + $0x178] sm:$0xff]   ;;  %v31_v14 = vld [vmem:[%s1125_s0 + $0x8] sm:$0xff] }
  0x28   :  { %884 = vmatprep.subr.bf16.mxu1 %v966_v21  ;;  %v1005_v12 = vld [vmem:[#allocation2 + $0x1b0] sm:$0xff]   ;;  %v1007_v13 = vld [vmem:[#allocation2 + $0x1f8] sm:$0xff]   ;;  %v58_v16 = vrot.slane %v31_v14, %v1098_v35  ;;  %v51_v17 = vcombine.high %v31_v14, %v31_v14 }
  0x29   :  { %v1008_v15 = vld [vmem:[#allocation2 + $0x138] sm:$0xff]  }
  0x2a   :  { %863 = vmatpush3.bf16.msra.mxu0 %v967_v25  ;;  %v1009_v18 = vld [vmem:[#allocation2 + $0x1b8] sm:$0xff]   ;;  %v66_v19 = vcombine.high %v58_v16, %v58_v16  ;;  %v65_v20 = vrot.slane %v51_v17, %v1098_v35  ;;  %v80_v21 = vpack.c.bf16 %v58_v16, %v58_v16 }
  0x2b   :  { %885 = vmatpush3.bf16.msra.mxu1 %v968_v26  ;;  %864 = vmatprep.subr.bf16.mxu0 %v969_v27  ;;  %v787_v27 = vld [vmem:[%s1127_s2] ss:$0 sm:$0xff]  ;;  %s1065_s2 = smov [#allocation5]  }
  0x2c   :  { %886 = vmatprep.subr.bf16.mxu1 %v970_v28  ;;  %v81_v22 = vpack.c.bf16 %v66_v19, %v66_v19  ;;  %v67_v23 = vcombine.high %v65_v20, %v65_v20  ;;  %v82_v24 = vpack.c.bf16 %v65_v20, %v65_v20  ;;  %s778_s30 = sshll.u32 %s1065_s2, 4  ;;  %s779_s30 = int_to_ptr.vmem [resolvable:$true] %s778_s30 }
  0x2d   :  { %s1035_s4 = scalar_lea.vmem %s779_s30, 32  ;;  %p1040_p9 = scmp.lt.s32.totalorder %s779_s30, %s779_s30 }
  0x2e   :  { %865 = vmatpush3.bf16.msra.mxu0 %v971_v31  ;;  %v83_v25 = vpack.c.bf16 %v67_v23, %v67_v23  ;;  %p1036_p8 = scmp.ne.s32.totalorder %s779_s30, %s1035_s4  ;;  %p1041_p10 = scmp.lt.s32.totalorder %s1035_s4, %s1035_s4 }
  0x2f   :  { %887 = vmatpush3.bf16.msra.mxu1 %v972_v32  ;;  %866 = vmatprep.subr.bf16.mxu0 %v973_v33 }
  0x30   :  { %888 = vmatprep.subr.bf16.mxu1 %v974_v34  ;;  %p1042_p11 = por %p1041_p10, %p1040_p9 }
  0x32   :  { %867 = vmatpush3.bf16.msra.mxu0 %v975_v36  ;;  %p1043_p12 = pnand %p1042_p11, %p1036_p8 }
  0x33   :  { %889 = vmatpush3.bf16.msra.mxu1 %v976_v37  ;;  %896 = vmatprep.subr.bf16.mxu0 %v978_v41 }
  0x34   :  { %918 = vmatprep.subr.bf16.mxu1 %v979_v42 }
  0x35   :  { %636 = vmatmul.mubr.bf16.vlgmr.msra.gmra.mrb[0].mxu0 %v76_v45 }
  0x36   :  { %897 = vmatpush3.bf16.msra.mxu0 %v980_v48  ;;  %676 = vmatmul.mubr.bf16.vlgmr.msra.gmra.mrb[0].mxu1 %v78_v49 }
  0x37   :  { %898 = vmatprep.subr.bf16.mxu0 %v982_v50  ;;  %919 = vmatpush3.bf16.msra.mxu1 %v981_v52 }
  0x38   :  { %920 = vmatprep.subr.bf16.mxu1 %v983_v53  ;;  %715 = vmatprep.mubr.bf16.mxu0 %v81_v22 }
  0x39   :  { %755 = vmatprep.mubr.bf16.mxu1 %v83_v25 }
  0x3a   :  { %899 = vmatpush3.bf16.msra.mxu0 %v984_v54 }
  0x3b   :  { %900 = vmatprep.subr.bf16.mxu0 %v986_v55  ;;  %921 = vmatpush3.bf16.msra.mxu1 %v985_v56 }
  0x3c   :  { %922 = vmatprep.subr.bf16.mxu1 %v987_v57 }
  0x3e   :  { %901 = vmatpush3.bf16.msra.mxu0 %v988_v58 }
  0x3f   :  { %902 = vmatprep.subr.bf16.mxu0 %v990_v59  ;;  %923 = vmatpush3.bf16.msra.mxu1 %v989_v60 }
  0x40   :  { %924 = vmatprep.subr.bf16.mxu1 %v991_v61 }
  0x42   :  { %903 = vmatpush3.bf16.msra.mxu0 %v992_v62 }
  0x43   :  { %904 = vmatprep.subr.bf16.mxu0 %v994_v63  ;;  %925 = vmatpush3.bf16.msra.mxu1 %v993_v0 }
  0x44   :  { %926 = vmatprep.subr.bf16.mxu1 %v995_v1 }
  0x46   :  { %905 = vmatpush3.bf16.msra.mxu0 %v996_v2 }
  0x47   :  { %906 = vmatprep.subr.bf16.mxu0 %v998_v3  ;;  %927 = vmatpush3.bf16.msra.mxu1 %v997_v4 }
  0x48   :  { %928 = vmatprep.subr.bf16.mxu1 %v999_v5 }
  0x4a   :  { %907 = vmatpush3.bf16.msra.mxu0 %v1000_v6 }
  0x4b   :  { %908 = vmatprep.subr.bf16.mxu0 %v1002_v7  ;;  %929 = vmatpush3.bf16.msra.mxu1 %v1001_v8 }
  0x4c   :  { %930 = vmatprep.subr.bf16.mxu1 %v1003_v9 }
  0x4e   :  { %909 = vmatpush3.bf16.msra.mxu0 %v1004_v10 }
  0x4f   :  { %910 = vmatprep.subr.bf16.mxu0 %v1006_v11  ;;  %931 = vmatpush3.bf16.msra.mxu1 %v1005_v12 }
  0x50   :  { %932 = vmatprep.subr.bf16.mxu1 %v1007_v13 }
  0x52   :  { %911 = vmatpush3.bf16.msra.mxu0 %v1008_v15 }
  0x53   :  { %933 = vmatpush3.bf16.msra.mxu1 %v1009_v18 }
  0x55   :  { %716 = vmatmul.mubr.bf16.vlgmr.msra.gmra.mrb[4].mxu0 %v80_v21 }
  0x56   :  { %756 = vmatmul.mubr.bf16.vlgmr.msra.gmra.mrb[4].mxu1 %v82_v24 }
 0x108   :  { %v868_v26 = vpop.f32.mrb[0].mxu0 }
 0x109   :  { %v869_v28 = vpop.f32.mrb[1].mxu0  ;;  %v890_v29 = vpop.f32.mrb[0].mxu1 }
 0x10a   :  { %v870_v30 = vadd.f32 %v869_v28, %v868_v26  ;;  %v871_v31 = vpop.f32.mrb[2].mxu0  ;;  %v891_v32 = vpop.f32.mrb[1].mxu1 }
 0x10b   :  { %v872_v33 = vpop.f32.mrb[3].mxu0  ;;  %v892_v35 = vadd.f32 %v891_v32, %v890_v29  ;;  %v893_v36 = vpop.f32.mrb[2].mxu1 }
 0x10c   :  { %v638_v34 = vadd.f32 %v870_v30, %v787_v27  ;;  %v894_v37 = vpop.f32.mrb[3].mxu1 }
 0x10e   :  { %v678_v38 = vadd.f32 %v892_v35, %v638_v34 }
 0x128   :  { %v912_v39 = vpop.f32.mrb[4].mxu0 }
 0x129   :  { %v913_v40 = vpop.f32.mrb[5].mxu0  ;;  %v934_v41 = vpop.f32.mrb[4].mxu1 }
 0x12a   :  { %v914_v42 = vadd.f32 %v913_v40, %v912_v39  ;;  %v915_v43 = vpop.f32.mrb[6].mxu0  ;;  %v935_v44 = vpop.f32.mrb[5].mxu1 }
 0x12b   :  { %v916_v45 = vpop.f32.mrb[7].mxu0  ;;  %v936_v47 = vadd.f32 %v935_v44, %v934_v41  ;;  %v937_v48 = vpop.f32.mrb[6].mxu1 }
 0x12c   :  { %v718_v46 = vadd.f32 %v914_v42, %v678_v38  ;;  %v938_v49 = vpop.f32.mrb[7].mxu1 }
 0x12e   :  { %v758_v50 = vadd.f32 %v936_v47, %v718_v46 }
 0x130   :  { %v763_v51 = vmul.f32 %v758_v50, %v758_v50 }
 0x132   :  { %v765_v52 = vsel %vm764_vm0, %v763_v51, 0.0 }
 0x133   :  { %766 = vadd.xlane.f32.xlu0 %v765_v52 }
 0x1c0   :  { %v767_v53 = vpop.xlane.xlu0 %766 }
 0x1c1   :  { %v768_v54 = vmax.f32 %v767_v53, 1e-24 }
 0x1c3   :  { %1011 = vrsqrt.f32 %v768_v54 }
 0x1cd   :  { %v1012_v55 = vpop.eup %1011 }
 0x1ce   :  { %v770_v56 = vmul.f32 %v1012_v55, %v758_v50 }
 0x1d0   :  { %771 = vst [vmem:[#allocation5] sm:$0x3] %v770_v56 }
 0x1d1   :  { %1046 = shalt.err (!%p1043_p12)
}
 0x1d2   :  { %s1047_s7 = scalar_lea.hbm %s1128_s3, 32 }
 0x1d3   :  { %p1048_p13 = scmp.ne.s32.totalorder %s1128_s3, %s1047_s7  ;;  %p1051_p0 = scmp.lt.u32.totalorder %s1047_s7, %s1128_s3 }
 0x1d5   :  { %p1053_p1 = pnand %p1051_p0, %p1048_p13 }
 0x1d7   :  { %1056 = shalt.err (!%p1053_p1)
}
 0x1d8   :  { %781 = dma.vmem_to_hbm [thread:$0]  %s779_s30, 32, %s1128_s3, [#allocation4]  }
 0x1d9   :  { %1059 = dma.done.wait [#allocation4], 32  }
 0x1da   :  { %1060 = vsyncadd [#allocation4], 4294967264 }
 0x1db   :  { %785 = vsyncpa [#allocation3], 1 }
 0x1dc   :  { %786 = vsyncpa [#allocation4], 1 }

</bundles_post_ra>
